<compile_context>
chip_gen: v7x
topology: tpu7x:2x2x1
jax: 0.10.0
libtpu: 0.0.40
codegen_flags: <defaults>
</compile_context>

<pallas_src>
import jax
import jax.numpy as jnp
from jax import lax
from jax.experimental import pallas as pl
from jax.experimental.pallas import tpu as pltpu


def two_layer_kernel(x_ref, w1_ref, b1_ref, w2_ref, b2_ref, o_ref):
    # hidden = relu(x @ W1^T + b1); contraction over the last dim of both
    # operands (torch weight layout), f32 accumulation on the MXU.
    h = lax.dot_general(
        x_ref[...], w1_ref[...],
        dimension_numbers=(((1,), (1,)), ((), ())),
        preferred_element_type=jnp.float32)
    h = jnp.maximum(h + b1_ref[...], 0.0)       # bias + ReLU on f32 accumulator
    h = h.astype(w2_ref.dtype)                  # downcast only after bias/ReLU

    # out = hidden @ W2^T + b2
    o = lax.dot_general(
        h, w2_ref[...],
        dimension_numbers=(((1,), (1,)), ((), ())),
        preferred_element_type=jnp.float32)
    o = o + b2_ref[...]
    o_ref[...] = o.astype(o_ref.dtype)


def two_layer_net(x, w1, b1, w2, b2, *,
                  compute_dtype=jnp.bfloat16, batch_tile=512):
    """Forward pass matching torch: relu(x @ w1.T + b1) @ w2.T + b2.

    x: [B, D_in]; w1: [D_h, D_in]; b1: [D_h]; w2: [D_out, D_h]; b2: [D_out].
    Weights are consumed in torch layout (no per-call transpose).
    """
    B, D_in = x.shape
    D_h = w1.shape[0]
    D_out = w2.shape[0]

    # MXU input dtype (in a real model, store the weights in bf16 at init so
    # this cast disappears entirely).  Biases stay f32: they add onto the f32
    # accumulator inside the kernel.
    xc = x.astype(compute_dtype)
    w1c = w1.astype(compute_dtype)
    w2c = w2.astype(compute_dtype)
    b1_2d = b1.reshape(1, D_h).astype(jnp.float32)
    b2_2d = b2.reshape(1, D_out).astype(jnp.float32)

    # Batch tile: full batch if small, otherwise a multiple-of-8 tile so the
    # sublane constraint holds; weights stay resident across grid steps.
    tb = B if B <= batch_tile else batch_tile
    grid = (pl.cdiv(B, tb),)

    itemsize = jnp.dtype(compute_dtype).itemsize
    cost = pl.CostEstimate(
        flops=2 * B * (D_in * D_h + D_h * D_out),
        transcendentals=0,
        bytes_accessed=(B * D_in * itemsize
                        + D_h * D_in * itemsize
                        + D_out * D_h * itemsize
                        + (D_h + D_out) * 4
                        + B * D_out * jnp.dtype(x.dtype).itemsize))

    return pl.pallas_call(
        two_layer_kernel,
        out_shape=jax.ShapeDtypeStruct((B, D_out), x.dtype),
        grid=grid,
        in_specs=[
            pl.BlockSpec((tb, D_in), lambda i: (i, 0)),     # x: streamed per tile
            pl.BlockSpec((D_h, D_in), lambda i: (0, 0)),    # W1: VMEM-resident
            pl.BlockSpec((1, D_h), lambda i: (0, 0)),       # b1: VMEM-resident
            pl.BlockSpec((D_out, D_h), lambda i: (0, 0)),   # W2: VMEM-resident
            pl.BlockSpec((1, D_out), lambda i: (0, 0)),     # b2: VMEM-resident
        ],
        out_specs=pl.BlockSpec((tb, D_out), lambda i: (i, 0)),
        compiler_params=pltpu.CompilerParams(
            dimension_semantics=("parallel",)),
        cost_estimate=cost,
    )(xc, w1c, b1_2d, w2c, b2_2d)


def init_linear_params(key, out_features, in_features):
    # Mimic torch.nn.Linear default init: U(-1/sqrt(fan_in), 1/sqrt(fan_in)).
    kw, kb = jax.random.split(key)
    bound = 1.0 / jnp.sqrt(jnp.float32(in_features))
    w = jax.random.uniform(kw, (out_features, in_features), jnp.float32,
                           -bound, bound)
    b = jax.random.uniform(kb, (out_features,), jnp.float32, -bound, bound)
    return w, b


if __name__ == "__main__":
    B, D_in, D_h, D_out = 8, 32, 64, 16

    key = jax.random.PRNGKey(0)
    kx, k1, k2 = jax.random.split(key, 3)

    x = jax.random.normal(kx, (B, D_in), jnp.float32)
    w1, b1 = init_linear_params(k1, D_h, D_in)
    w2, b2 = init_linear_params(k2, D_out, D_h)

    # Pure-JAX reference (same semantics as the torch forward).
    ref = jnp.maximum(x @ w1.T + b1, 0.0) @ w2.T + b2

    # f32 path: exact-tolerance check.
    out_f32 = two_layer_net(x, w1, b1, w2, b2, compute_dtype=jnp.float32)
    out_f32 = jax.block_until_ready(out_f32)
    assert out_f32.shape == (B, D_out)
    assert jnp.allclose(out_f32, ref, atol=1e-5, rtol=1e-5)

    # bf16-MXU path (recommended on v6e/v7x): f32 accumulation, looser tol.
    out_bf16 = two_layer_net(x, w1, b1, w2, b2, compute_dtype=jnp.bfloat16)
    out_bf16 = jax.block_until_ready(out_bf16)
    assert out_bf16.shape == (B, D_out)
    assert jnp.allclose(out_bf16, ref, atol=2e-2, rtol=2e-2)

    print("KERNEL_OK")
</pallas_src>

<mosaic_0001>
module attributes {stable_mosaic.version = 11 : i64} {
  func.func @two_layer_kernel(%arg0: i32, %arg1: memref<8x32xf32, #tpu.memory_space<vmem>>, %arg2: memref<64x32xf32, #tpu.memory_space<vmem>>, %arg3: memref<1x64xf32, #tpu.memory_space<vmem>>, %arg4: memref<16x64xf32, #tpu.memory_space<vmem>>, %arg5: memref<1x16xf32, #tpu.memory_space<vmem>>, %arg6: memref<8x16xf32, #tpu.memory_space<vmem>>) attributes {dimension_semantics = [#tpu.dimension_semantics<parallel>], iteration_bounds = array<i64: 1>, scalar_prefetch = 0 : i64, scratch_operands = 0 : i64, tpu.core_type = #tpu.core_type<tc>, window_params = [{transform_indices = @transform_0, window_bounds = array<i64: 8, 32>}, {pipeline_mode = #tpu.pipeline_mode<synchronous>, transform_indices = @transform_1, window_bounds = array<i64: 64, 32>}, {pipeline_mode = #tpu.pipeline_mode<synchronous>, transform_indices = @transform_2, window_bounds = array<i64: 1, 64>}, {pipeline_mode = #tpu.pipeline_mode<synchronous>, transform_indices = @transform_3, window_bounds = array<i64: 16, 64>}, {pipeline_mode = #tpu.pipeline_mode<synchronous>, transform_indices = @transform_4, window_bounds = array<i64: 1, 16>}, {transform_indices = @transform_5, window_bounds = array<i64: 8, 16>}]} {
    %c0 = arith.constant 0 : index
    %c0_0 = arith.constant 0 : index
    %0 = vector.load %arg1[%c0, %c0_0] : memref<8x32xf32, #tpu.memory_space<vmem>>, vector<8x32xf32>
    %c0_1 = arith.constant 0 : index
    %c0_2 = arith.constant 0 : index
    %1 = vector.load %arg2[%c0_1, %c0_2] : memref<64x32xf32, #tpu.memory_space<vmem>>, vector<64x32xf32>
    %cst = arith.constant dense<0.000000e+00> : vector<8x64xf32>
    %2 = tpu.matmul %0, %1, %cst {dimension_numbers = #tpu.dot_dimension_numbers<[1], [1], [0], [0], [0, 0, 1, 0], [], []>} : vector<8x32xf32>, vector<64x32xf32>, vector<8x64xf32> -> vector<8x64xf32>
    %c0_3 = arith.constant 0 : index
    %c0_4 = arith.constant 0 : index
    %3 = vector.load %arg3[%c0_3, %c0_4] : memref<1x64xf32, #tpu.memory_space<vmem>>, vector<1x64xf32>
    %4 = vector.broadcast %3 : vector<1x64xf32> to vector<8x64xf32>
    %5 = arith.addf %2, %4 : vector<8x64xf32>
    %cst_5 = arith.constant 0.000000e+00 : f32
    %6 = vector.broadcast %cst_5 : f32 to vector<8x64xf32>
    %7 = arith.maximumf %5, %6 : vector<8x64xf32>
    %c0_6 = arith.constant 0 : index
    %c0_7 = arith.constant 0 : index
    %8 = vector.load %arg4[%c0_6, %c0_7] : memref<16x64xf32, #tpu.memory_space<vmem>>, vector<16x64xf32>
    %cst_8 = arith.constant dense<0.000000e+00> : vector<8x16xf32>
    %9 = tpu.matmul %7, %8, %cst_8 {dimension_numbers = #tpu.dot_dimension_numbers<[1], [1], [0], [0], [0, 0, 1, 0], [], []>} : vector<8x64xf32>, vector<16x64xf32>, vector<8x16xf32> -> vector<8x16xf32>
    %c0_9 = arith.constant 0 : index
    %c0_10 = arith.constant 0 : index
    %10 = vector.load %arg5[%c0_9, %c0_10] : memref<1x16xf32, #tpu.memory_space<vmem>>, vector<1x16xf32>
    %11 = vector.broadcast %10 : vector<1x16xf32> to vector<8x16xf32>
    %12 = arith.addf %9, %11 : vector<8x16xf32>
    %c0_11 = arith.constant 0 : index
    %c0_12 = arith.constant 0 : index
    %13 = vector.load %arg6[%c0_11, %c0_12] : memref<8x16xf32, #tpu.memory_space<vmem>>, vector<8x16xf32>
    tpu.vector_store %arg6[%c0_11, %c0_12], %12 {strides = array<i32>} : memref<8x16xf32, #tpu.memory_space<vmem>>, vector<8x16xf32>,
    return
  }
  func.func @transform_0(%arg0: i32) -> (i32, i32) {
    %c0_i32 = arith.constant 0 : i32
    %c0_i32_0 = arith.constant 0 : i32
    return %arg0, %c0_i32 : i32, i32
  }
  func.func @transform_1(%arg0: i32) -> (i32, i32) {
    %c0_i32 = arith.constant 0 : i32
    %c0_i32_0 = arith.constant 0 : i32
    %c0_i32_1 = arith.constant 0 : i32
    return %c0_i32, %c0_i32_0 : i32, i32
  }
  func.func @transform_2(%arg0: i32) -> (i32, i32) {
    %c0_i32 = arith.constant 0 : i32
    %c0_i32_0 = arith.constant 0 : i32
    %c0_i32_1 = arith.constant 0 : i32
    return %c0_i32, %c0_i32_0 : i32, i32
  }
  func.func @transform_3(%arg0: i32) -> (i32, i32) {
    %c0_i32 = arith.constant 0 : i32
    %c0_i32_0 = arith.constant 0 : i32
    %c0_i32_1 = arith.constant 0 : i32
    return %c0_i32, %c0_i32_0 : i32, i32
  }
  func.func @transform_4(%arg0: i32) -> (i32, i32) {
    %c0_i32 = arith.constant 0 : i32
    %c0_i32_0 = arith.constant 0 : i32
    %c0_i32_1 = arith.constant 0 : i32
    return %c0_i32, %c0_i32_0 : i32, i32
  }
  func.func @transform_5(%arg0: i32) -> (i32, i32) {
    %c0_i32 = arith.constant 0 : i32
    %c0_i32_0 = arith.constant 0 : i32
    return %arg0, %c0_i32 : i32, i32
  }
}

</mosaic_0001>

<bundles_post_ra>
// kernel: tpu_custom_call.1
= control target key start
LH: loop header
LB: loop body
LE: loop exit
PB: predicated region body
PF: predicated region fallthrough
CT: control target
= control target key end

     0   :  { %vm37_vm0 = vcmask 261120   ;;  %v341_v2 = vmov 0.0|0.0   ;;  %vm145_vm2 = vcmask 523264   ;;  %vm342_vm3 = vmmov 0   ;;  %s444_s0 = inlined_call_operand.vmem [shape: f32[8,32], index: 0, kind: input, shape index: {}]   ;;  %s445_s1 = inlined_call_operand.vmem [shape: f32[64,32], index: 1, kind: input, shape index: {}]   ;;  %s446_s2 = inlined_call_operand.vmem [shape: f32[1,64], index: 2, kind: input, shape index: {}]   ;;  %s447_s3 = inlined_call_operand.vmem [shape: f32[16,64], index: 3, kind: input, shape index: {}]   ;;  %s448_s4 = inlined_call_operand.vmem [shape: f32[1,16], index: 4, kind: input, shape index: {}]   ;;  %s449_s5 = inlined_call_operand.hbm [shape: f32[8,16], index: 5, kind: output, shape index: {}]  }
   0x1   :  { %v22_v0 = vld [vmem:[%s445_s1] sm:$0xff]  ;;  %v23_v1 = vld [vmem:[%s445_s1 + $0x8] sm:$0xff]  ;;  %293 = vmatprep.subr.bf16.mxu0 %v341_v2  ;;  %vm383_vm1 = vmpackc.low %vm37_vm0, %vm37_vm0  ;;  %309 = vmatprep.subr.bf16.mxu1 %v341_v2  ;;  %v343_v5 = vmov 0.0  }
   0x2   :  { %v294_v3 = vpack.c.bf16 %v23_v1, %v22_v0  ;;  %283 = vmatprep.mubr.msk.f32.mxu0 %vm342_vm3, %v343_v5  ;;  %290 = vmatprep.mubr.msk.f32.mxu1 %vm342_vm3, %v343_v5  ;;  %v136_v6 = vld [vmem:[%s447_s3] sm:$0xff]  ;;  %v137_v7 = vld [vmem:[%s447_s3 + $0x8] sm:$0xff]  ;;  %v24_v8 = vld [vmem:[%s445_s1 + $0x10] sm:$0xff] }
   0x3   :  { %v25_v9 = vld [vmem:[%s445_s1 + $0x18] sm:$0xff]  ;;  %v310_v10 = vpack.c.bf16 %v137_v7, %v136_v6  ;;  %vm311_vm4 = vmpackc.low %vm145_vm2, %vm145_vm2 }
   0x4   :  { %296 = vmatpush3.bf16.xpose.msk.msra.mxu0 %vm383_vm1, %v294_v3 }
   0x5   :  { %297 = vmatprep.subr.bf16.mxu0 %v341_v2 }
   0x6   :  { %10 = vsyncpa [#allocation3], 0  ;;  %312 = vmatpush3.bf16.xpose.msk.msra.mxu1 %vm311_vm4, %v310_v10  ;;  %v298_v11 = vpack.c.bf16 %v25_v9, %v24_v8  ;;  %v26_v12 = vld [vmem:[%s445_s1 + $0x20] sm:$0xff]  ;;  %v27_v13 = vld [vmem:[%s445_s1 + $0x28] sm:$0xff]  ;;  %s344_s17 = smov [#allocation2]   ;;  %vm225_vm5 = vcmask 130048  }
   0x7   :  { %v302_v14 = vpack.c.bf16 %v27_v13, %v26_v12  ;;  %v28_v15 = vld [vmem:[%s445_s1 + $0x30] sm:$0xff]  ;;  %v29_v16 = vld [vmem:[%s445_s1 + $0x38] sm:$0xff]  ;;  %v21_v18 = vld [vmem:[%s444_s0] sm:$0xff]  ;;  %s233_s18 = sshll.u32 %s344_s17, 4  ;;  %s234_s18 = int_to_ptr.vmem [resolvable:$true] %s233_s18 }
   0x8   :  { %v306_v17 = vpack.c.bf16 %v29_v16, %v28_v15  ;;  %v241_v19 = vld [vmem:[%s446_s2] ss:$0 sm:$0xff]  ;;  %s317_s0 = scalar_lea.vmem %s234_s18, 128  ;;  %p322_p1 = scmp.lt.s32.totalorder %s234_s18, %s234_s18 }
   0x9   :  { %v251_v24 = vld [vmem:[%s448_s4] ss:$0 sm:$0xff]  ;;  %p318_p0 = scmp.ne.s32.totalorder %s234_s18, %s317_s0  ;;  %p323_p2 = scmp.lt.s32.totalorder %s317_s0, %s317_s0 }
   0xb   :  { %p324_p3 = por %p323_p2, %p322_p1 }
   0xc   :  { %300 = vmatpush3.bf16.xpose.msk.msra.mxu0 %vm383_vm1, %v298_v11 }
   0xd   :  { %301 = vmatprep.subr.bf16.mxu0 %v341_v2  ;;  %p325_p4 = pnand %p324_p3, %p318_p0 }
  0x14   :  { %304 = vmatpush3.bf16.xpose.msk.msra.mxu0 %vm383_vm1, %v302_v14 }
  0x15   :  { %305 = vmatprep.subr.bf16.mxu0 %v341_v2 }
  0x1c   :  { %308 = vmatpush3.bf16.xpose.msk.msra.mxu0 %vm383_vm1, %v306_v17 }
  0x23   :  { %284 = vmatmul.mubr.msk.f32.vlgmr.msra.gmra.mrb[0].mxu0 %vm37_vm0, %v21_v18 }
  0xf6   :  { %v131_v20 = vpop.f32.mrb[0].mxu0 }
  0xf7   :  { %v132_v21 = vadd.f32 %v241_v19, %v131_v20  ;;  %v285_v22 = vpop.f32.mrb[1].mxu0 }
  0xf9   :  { %v135_v23 = vmax.f32 %v132_v21, 0.0 }
  0xfb   :  { %291 = vmatmul.mubr.msk.f32.vlgmr.msra.gmra.mrb[0].mxu1 %vm145_vm2, %v135_v23 }
 0x1ce   :  { %v221_v25 = vpop.f32.mrb[0].mxu1 }
 0x1cf   :  { %v222_v26 = vadd.f32 %v251_v24, %v221_v25  ;;  %v292_v27 = vpop.f32.mrb[1].mxu1 }
 0x1d1   :  { %226 = vst.msk [vmem:[#allocation2] sm:$0xff] %vm225_vm5, %v222_v26 }
 0x1d2   :  { %328 = shalt.err (!%p325_p4)
}
 0x1d3   :  { %s329_s20 = scalar_lea.hbm %s449_s5, 128 }
 0x1d4   :  { %p330_p5 = scmp.ne.s32.totalorder %s449_s5, %s329_s20  ;;  %p333_p6 = scmp.lt.u32.totalorder %s329_s20, %s449_s5 }
 0x1d6   :  { %p335_p7 = pnand %p333_p6, %p330_p5 }
 0x1d8   :  { %338 = shalt.err (!%p335_p7)
}
 0x1d9   :  { %236 = dma.vmem_to_hbm [thread:$0]  %s234_s18, 128, %s449_s5, [#allocation3]  }
 0x1da   :  { %339 = dma.done.wait [#allocation3], 128  }
 0x1db   :  { %340 = vsyncadd [#allocation3], 4294967168 }
 0x1dc   :  { %240 = vsyncpa [#allocation3], 1 }

</bundles_post_ra>
